<compile_context>
chip_gen: v7x
topology: tpu7x:2x2x1
jax: 0.10.0
libtpu: 0.0.40
codegen_flags: <defaults>
</compile_context>

<pallas_src>
import functools

import jax
import jax.numpy as jnp
from jax.experimental import pallas as pl
from jax.experimental.pallas import tpu as pltpu

_MIB = 1024 * 1024


def _round_up(x, m):
    return ((x + m - 1) // m) * m


def _round_down(x, m):
    return (x // m) * m


def _vmem_capacity_bytes():
    """Physical VMEM per core; conservative 64 MiB (v7x) fallback."""
    try:
        cap = getattr(pltpu.get_tpu_info(), "vmem_capacity_bytes", None)
        if cap:
            return int(cap)
    except Exception:
        pass
    return 64 * _MIB


def _head_kernel(feat_ref, w1_ref, b1_ref, w2_ref, b2_ref, out_ref, acc_ref,
                 *, seq_len, seq_tile, ragged_seq):
    s = pl.program_id(1)

    @pl.when(s == 0)
    def _init():
        acc_ref[...] = jnp.zeros_like(acc_ref)

    # Partial sum over this sequence tile (f32 accumulation).
    x = feat_ref[...].astype(jnp.float32)
    if ragged_seq:
        # Mask rows past the true sequence length (only the last tile is
        # actually partial; the compare is all-true elsewhere).
        seq_idx = jax.lax.broadcasted_iota(jnp.int32, x.shape, 1)
        x = jnp.where(seq_idx < (seq_len - s * seq_tile), x, 0.0)
    acc_ref[...] += jnp.sum(x, axis=1)

    @pl.when(s == pl.num_programs(1) - 1)
    def _finalize():
        pooled = acc_ref[...] * (1.0 / seq_len)      # exact mean over true S
        # dropout is identity at inference
        h = jnp.dot(pooled.astype(w1_ref.dtype), w1_ref[...],
                    preferred_element_type=jnp.float32) + b1_ref[...]
        h = jnp.tanh(h)
        # dropout (identity) + out_proj
        y = jnp.dot(h.astype(w2_ref.dtype), w2_ref[...],
                    preferred_element_type=jnp.float32) + b2_ref[...]
        out_ref[...] = y.astype(out_ref.dtype)


def bert_avg_pool_classification_head(features, w1, b1, w2, b2):
    """features: [B, S, H]; w1: [H, H] ([in,out]); b1: [H]; w2: [H, L]; b2: [L]."""
    B, S, H = features.shape
    L = w2.shape[1]
    out_dtype = jnp.promote_types(features.dtype, w2.dtype)  # keep f32 logits if weights are f32

    # ---- tile selection ------------------------------------------------------
    feat_itemsize = features.dtype.itemsize
    sublane = {4: 8, 2: 16, 1: 32}.get(feat_itemsize, 8)   # dtype-aware sublane granule

    # Batch tile: >=2 sublane-aligned parallel tiles when B allows it (so both
    # v7x TensorCores are fed); otherwise a single full-batch tile.
    if B >= 2 * 8:
        TB = min(256, _round_up(-(-B // 2), 8))
    else:
        TB = B
    n_b = -(-B // TB)

    L_pad = _round_up(max(L, 128), 128)                    # lane-dense output slab

    # ---- VMEM budget -> sequence tile ---------------------------------------
    vmem_cap = _vmem_capacity_bytes()
    vmem_limit = (vmem_cap * 7) // 8                       # leave compiler headroom
    # Conservatively budget the resident weights as double-buffered (the
    # Buffered(1) request below may be ignored / unsupported).
    weight_bytes = 2 * (w1.size * w1.dtype.itemsize
                        + H * b1.dtype.itemsize
                        + H * L_pad * w2.dtype.itemsize
                        + L_pad * b2.dtype.itemsize)
    fixed_bytes = (weight_bytes
                   + TB * H * 4                            # f32 accumulator scratch
                   + 2 * TB * L_pad * jnp.dtype(out_dtype).itemsize)
    feat_budget = vmem_limit - 4 * _MIB - fixed_bytes
    ts_max = feat_budget // (2 * TB * H * feat_itemsize)   # feature tile is double-buffered
    if ts_max >= S:
        TS = S                                             # single seq step, full-dim block
    else:
        TS = max(sublane, _round_down(int(ts_max), sublane))
    n_s = -(-S // TS)
    ragged_seq = (S % TS) != 0

    # ---- small (cheap) weight-side padding only ------------------------------
    w2p = jnp.pad(w2, ((0, 0), (0, L_pad - L)))
    b1p = jnp.reshape(b1, (1, H))
    b2p = jnp.pad(jnp.reshape(b2, (1, L)), ((0, 0), (0, L_pad - L)))

    kernel = functools.partial(_head_kernel, seq_len=S, seq_tile=TS,
                               ragged_seq=ragged_seq)

    def build(single_buffer_weights):
        w_kw = dict(pipeline_mode=pl.Buffered(1)) if single_buffer_weights else {}
        grid_spec = pltpu.PrefetchScalarGridSpec(
            num_scalar_prefetch=0,
            grid=(n_b, n_s),                               # reduction (seq) axis last
            in_specs=[
                # features: only (TB, TS, H) tiles ever hit VMEM, no HBM-side pad
                pl.BlockSpec((TB, TS, H), lambda i, s: (i, s, 0)),
                # weights/biases: constant index maps -> VMEM-resident
                pl.BlockSpec((H, H), lambda i, s: (0, 0), **w_kw),
                pl.BlockSpec((1, H), lambda i, s: (0, 0), **w_kw),
                pl.BlockSpec((H, L_pad), lambda i, s: (0, 0), **w_kw),
                pl.BlockSpec((1, L_pad), lambda i, s: (0, 0), **w_kw),
            ],
            out_specs=pl.BlockSpec((TB, L_pad), lambda i, s: (i, 0)),
            scratch_shapes=[pltpu.VMEM((TB, H), jnp.float32)],
        )
        return pl.pallas_call(
            kernel,
            out_shape=jax.ShapeDtypeStruct((B, L_pad), out_dtype),
            grid_spec=grid_spec,
            compiler_params=pltpu.CompilerParams(
                dimension_semantics=("parallel", "arbitrary"),
                vmem_limit_bytes=int(vmem_limit)),
        )

    try:
        out = build(single_buffer_weights=True)(features, w1, b1p, w2p, b2p)
    except Exception:
        # Fallback: default double-buffered resident weights (already budgeted).
        out = build(single_buffer_weights=False)(features, w1, b1p, w2p, b2p)

    return out[:, :L]


def reference(features, w1, b1, w2, b2):
    x = jnp.mean(features, axis=1)
    x = jnp.tanh(x @ w1 + b1)
    return x @ w2 + b2


if __name__ == "__main__":
    # Small synthetic config: batch=2, seq=8, hidden=32, num_labels=4
    B, S, H, L = 2, 8, 32, 4
    key = jax.random.PRNGKey(0)
    k_feat, k_w1, k_b1, k_w2, k_b2 = jax.random.split(key, 5)

    features = jax.random.normal(k_feat, (B, S, H), dtype=jnp.float32)
    # nn.Linear(hidden, hidden): stored as [in, out], bias 1-D
    w1 = jax.random.normal(k_w1, (H, H), dtype=jnp.float32) * 0.05
    b1 = jax.random.normal(k_b1, (H,), dtype=jnp.float32) * 0.05
    # nn.Linear(hidden, num_labels)
    w2 = jax.random.normal(k_w2, (H, L), dtype=jnp.float32) * 0.05
    b2 = jax.random.normal(k_b2, (L,), dtype=jnp.float32) * 0.05

    out = bert_avg_pool_classification_head(features, w1, b1, w2, b2)
    out = jax.block_until_ready(out)

    ref = reference(features, w1, b1, w2, b2)
    assert out.shape == (B, L)
    assert jnp.allclose(out, ref, atol=1e-4, rtol=1e-4), float(jnp.max(jnp.abs(out - ref)))

    print("KERNEL_OK")
</pallas_src>

<mosaic_0001>
module attributes {stable_mosaic.version = 11 : i64} {
  func.func @_head_kernel(%arg0: i32, %arg1: i32, %arg2: memref<2x8x32xf32, #tpu.memory_space<vmem>>, %arg3: memref<32x32xf32, #tpu.memory_space<vmem>>, %arg4: memref<1x32xf32, #tpu.memory_space<vmem>>, %arg5: memref<32x128xf32, #tpu.memory_space<vmem>>, %arg6: memref<1x128xf32, #tpu.memory_space<vmem>>, %arg7: memref<2x128xf32, #tpu.memory_space<vmem>>, %arg8: memref<2x32xf32, #tpu.memory_space<vmem>>) attributes {dimension_semantics = [#tpu.dimension_semantics<parallel>, #tpu.dimension_semantics<arbitrary>], iteration_bounds = array<i64: 1, 1>, scalar_prefetch = 0 : i64, scratch_operands = 1 : i64, tpu.core_type = #tpu.core_type<tc>, window_params = [{transform_indices = @transform_0, window_bounds = array<i64: 2, 8, 32>}, {pipeline_mode = #tpu.pipeline_mode<synchronous>, transform_indices = @transform_1, window_bounds = array<i64: 32, 32>}, {pipeline_mode = #tpu.pipeline_mode<synchronous>, transform_indices = @transform_2, window_bounds = array<i64: 1, 32>}, {pipeline_mode = #tpu.pipeline_mode<synchronous>, transform_indices = @transform_3, window_bounds = array<i64: 32, 128>}, {pipeline_mode = #tpu.pipeline_mode<synchronous>, transform_indices = @transform_4, window_bounds = array<i64: 1, 128>}, {transform_indices = @transform_5, window_bounds = array<i64: 2, 128>}]} {
    %c0_i32 = arith.constant 0 : i32
    %0 = arith.cmpi eq, %arg1, %c0_i32 : i32
    %1 = arith.extui %0 : i1 to i32
    %c0_i32_0 = arith.constant 0 : i32
    %2 = arith.cmpi ne, %1, %c0_i32_0 : i32
    scf.if %2 {
      %cst_9 = arith.constant 0.000000e+00 : f32
      %11 = vector.broadcast %cst_9 : f32 to vector<2x32xf32>
      %c0_10 = arith.constant 0 : index
      %c0_11 = arith.constant 0 : index
      %12 = vector.load %arg8[%c0_10, %c0_11] : memref<2x32xf32, #tpu.memory_space<vmem>>, vector<2x32xf32>
      tpu.vector_store %arg8[%c0_10, %c0_11], %11 {strides = array<i32>} : memref<2x32xf32, #tpu.memory_space<vmem>>, vector<2x32xf32>,
    } else {
    }
    %c0 = arith.constant 0 : index
    %c0_1 = arith.constant 0 : index
    %c0_2 = arith.constant 0 : index
    %3 = vector.load %arg2[%c0, %c0_1, %c0_2] : memref<2x8x32xf32, #tpu.memory_space<vmem>>, vector<2x8x32xf32>
    %c0_3 = arith.constant 0 : index
    %c0_4 = arith.constant 0 : index
    %4 = vector.load %arg8[%c0_3, %c0_4] : memref<2x32xf32, #tpu.memory_space<vmem>>, vector<2x32xf32>
    %cst = arith.constant dense<0.000000e+00> : vector<2x32xf32>
    %5 = vector.multi_reduction <add>, %3, %cst [1] : vector<2x8x32xf32> to vector<2x32xf32>
    %6 = arith.addf %4, %5 : vector<2x32xf32>
    %c0_5 = arith.constant 0 : index
    %c0_6 = arith.constant 0 : index
    %7 = vector.load %arg8[%c0_5, %c0_6] : memref<2x32xf32, #tpu.memory_space<vmem>>, vector<2x32xf32>
    tpu.vector_store %arg8[%c0_5, %c0_6], %6 {strides = array<i32>} : memref<2x32xf32, #tpu.memory_space<vmem>>, vector<2x32xf32>,
    %c0_i32_7 = arith.constant 0 : i32
    %8 = arith.cmpi eq, %arg1, %c0_i32_7 : i32
    %9 = arith.extui %8 : i1 to i32
    %c0_i32_8 = arith.constant 0 : i32
    %10 = arith.cmpi ne, %9, %c0_i32_8 : i32
    scf.if %10 {
      %c0_9 = arith.constant 0 : index
      %c0_10 = arith.constant 0 : index
      %11 = vector.load %arg8[%c0_9, %c0_10] : memref<2x32xf32, #tpu.memory_space<vmem>>, vector<2x32xf32>
      %cst_11 = arith.constant 1.250000e-01 : f32
      %12 = vector.broadcast %cst_11 : f32 to vector<2x32xf32>
      %13 = arith.mulf %11, %12 : vector<2x32xf32>
      %c0_12 = arith.constant 0 : index
      %c0_13 = arith.constant 0 : index
      %14 = vector.load %arg3[%c0_12, %c0_13] : memref<32x32xf32, #tpu.memory_space<vmem>>, vector<32x32xf32>
      %cst_14 = arith.constant dense<0.000000e+00> : vector<2x32xf32>
      %15 = tpu.matmul %13, %14, %cst_14 {dimension_numbers = #tpu.dot_dimension_numbers<[1], [0], [0], [1], [0, 0, 1, 1], [], []>} : vector<2x32xf32>, vector<32x32xf32>, vector<2x32xf32> -> vector<2x32xf32>
      %c0_15 = arith.constant 0 : index
      %c0_16 = arith.constant 0 : index
      %16 = vector.load %arg4[%c0_15, %c0_16] : memref<1x32xf32, #tpu.memory_space<vmem>>, vector<1x32xf32>
      %17 = vector.broadcast %16 : vector<1x32xf32> to vector<2x32xf32>
      %18 = arith.addf %15, %17 : vector<2x32xf32>
      %19 = math.tanh %18 : vector<2x32xf32>
      %c0_17 = arith.constant 0 : index
      %c0_18 = arith.constant 0 : index
      %20 = vector.load %arg5[%c0_17, %c0_18] : memref<32x128xf32, #tpu.memory_space<vmem>>, vector<32x128xf32>
      %cst_19 = arith.constant dense<0.000000e+00> : vector<2x128xf32>
      %21 = tpu.matmul %19, %20, %cst_19 {dimension_numbers = #tpu.dot_dimension_numbers<[1], [0], [0], [1], [0, 0, 1, 1], [], []>} : vector<2x32xf32>, vector<32x128xf32>, vector<2x128xf32> -> vector<2x128xf32>
      %c0_20 = arith.constant 0 : index
      %c0_21 = arith.constant 0 : index
      %22 = vector.load %arg6[%c0_20, %c0_21] : memref<1x128xf32, #tpu.memory_space<vmem>>, vector<1x128xf32>
      %23 = vector.broadcast %22 : vector<1x128xf32> to vector<2x128xf32>
      %24 = arith.addf %21, %23 : vector<2x128xf32>
      %c0_22 = arith.constant 0 : index
      %c0_23 = arith.constant 0 : index
      %25 = vector.load %arg7[%c0_22, %c0_23] : memref<2x128xf32, #tpu.memory_space<vmem>>, vector<2x128xf32>
      tpu.vector_store %arg7[%c0_22, %c0_23], %24 {strides = array<i32>} : memref<2x128xf32, #tpu.memory_space<vmem>>, vector<2x128xf32>,
    } else {
    }
    return
  }
  func.func @transform_0(%arg0: i32, %arg1: i32) -> (i32, i32, i32) {
    %c0_i32 = arith.constant 0 : i32
    %c0_i32_0 = arith.constant 0 : i32
    return %arg0, %arg1, %c0_i32 : i32, i32, i32
  }
  func.func @transform_1(%arg0: i32, %arg1: i32) -> (i32, i32) {
    %c0_i32 = arith.constant 0 : i32
    %c0_i32_0 = arith.constant 0 : i32
    %c0_i32_1 = arith.constant 0 : i32
    return %c0_i32, %c0_i32_0 : i32, i32
  }
  func.func @transform_2(%arg0: i32, %arg1: i32) -> (i32, i32) {
    %c0_i32 = arith.constant 0 : i32
    %c0_i32_0 = arith.constant 0 : i32
    %c0_i32_1 = arith.constant 0 : i32
    return %c0_i32, %c0_i32_0 : i32, i32
  }
  func.func @transform_3(%arg0: i32, %arg1: i32) -> (i32, i32) {
    %c0_i32 = arith.constant 0 : i32
    %c0_i32_0 = arith.constant 0 : i32
    %c0_i32_1 = arith.constant 0 : i32
    return %c0_i32, %c0_i32_0 : i32, i32
  }
  func.func @transform_4(%arg0: i32, %arg1: i32) -> (i32, i32) {
    %c0_i32 = arith.constant 0 : i32
    %c0_i32_0 = arith.constant 0 : i32
    %c0_i32_1 = arith.constant 0 : i32
    return %c0_i32, %c0_i32_0 : i32, i32
  }
  func.func @transform_5(%arg0: i32, %arg1: i32) -> (i32, i32) {
    %c0_i32 = arith.constant 0 : i32
    %c0_i32_0 = arith.constant 0 : i32
    return %arg0, %c0_i32 : i32, i32
  }
}

module attributes {stable_mosaic.version = 11 : i64} {
  func.func @_head_kernel(%arg0: i32, %arg1: i32, %arg2: memref<2x8x32xf32, #tpu.memory_space<vmem>>, %arg3: memref<32x32xf32, #tpu.memory_space<vmem>>, %arg4: memref<1x32xf32, #tpu.memory_space<vmem>>, %arg5: memref<32x128xf32, #tpu.memory_space<vmem>>, %arg6: memref<1x128xf32, #tpu.memory_space<vmem>>, %arg7: memref<2x128xf32, #tpu.memory_space<vmem>>, %arg8: memref<2x32xf32, #tpu.memory_space<vmem>>) attributes {dimension_semantics = [#tpu.dimension_semantics<parallel>, #tpu.dimension_semantics<arbitrary>], iteration_bounds = array<i64: 1, 1>, scalar_prefetch = 0 : i64, scratch_operands = 1 : i64, tpu.core_type = #tpu.core_type<tc>, window_params = [{transform_indices = @transform_0, window_bounds = array<i64: 2, 8, 32>}, {pipeline_mode = #tpu.pipeline_mode<synchronous>, transform_indices = @transform_1, window_bounds = array<i64: 32, 32>}, {pipeline_mode = #tpu.pipeline_mode<synchronous>, transform_indices = @transform_2, window_bounds = array<i64: 1, 32>}, {pipeline_mode = #tpu.pipeline_mode<synchronous>, transform_indices = @transform_3, window_bounds = array<i64: 32, 128>}, {pipeline_mode = #tpu.pipeline_mode<synchronous>, transform_indices = @transform_4, window_bounds = array<i64: 1, 128>}, {transform_indices = @transform_5, window_bounds = array<i64: 2, 128>}]} {
    %c0_i32 = arith.constant 0 : i32
    %0 = arith.cmpi eq, %arg1, %c0_i32 : i32
    %1 = arith.extui %0 : i1 to i32
    %c0_i32_0 = arith.constant 0 : i32
    %2 = arith.cmpi ne, %1, %c0_i32_0 : i32
    scf.if %2 {
      %cst_9 = arith.constant 0.000000e+00 : f32
      %11 = vector.broadcast %cst_9 : f32 to vector<2x32xf32>
      %c0_10 = arith.constant 0 : index
      %c0_11 = arith.constant 0 : index
      %12 = vector.load %arg8[%c0_10, %c0_11] : memref<2x32xf32, #tpu.memory_space<vmem>>, vector<2x32xf32>
      tpu.vector_store %arg8[%c0_10, %c0_11], %11 {strides = array<i32>} : memref<2x32xf32, #tpu.memory_space<vmem>>, vector<2x32xf32>,
    } else {
    }
    %c0 = arith.constant 0 : index
    %c0_1 = arith.constant 0 : index
    %c0_2 = arith.constant 0 : index
    %3 = vector.load %arg2[%c0, %c0_1, %c0_2] : memref<2x8x32xf32, #tpu.memory_space<vmem>>, vector<2x8x32xf32>
    %c0_3 = arith.constant 0 : index
    %c0_4 = arith.constant 0 : index
    %4 = vector.load %arg8[%c0_3, %c0_4] : memref<2x32xf32, #tpu.memory_space<vmem>>, vector<2x32xf32>
    %cst = arith.constant dense<0.000000e+00> : vector<2x32xf32>
    %5 = vector.multi_reduction <add>, %3, %cst [1] : vector<2x8x32xf32> to vector<2x32xf32>
    %6 = arith.addf %4, %5 : vector<2x32xf32>
    %c0_5 = arith.constant 0 : index
    %c0_6 = arith.constant 0 : index
    %7 = vector.load %arg8[%c0_5, %c0_6] : memref<2x32xf32, #tpu.memory_space<vmem>>, vector<2x32xf32>
    tpu.vector_store %arg8[%c0_5, %c0_6], %6 {strides = array<i32>} : memref<2x32xf32, #tpu.memory_space<vmem>>, vector<2x32xf32>,
    %c0_i32_7 = arith.constant 0 : i32
    %8 = arith.cmpi eq, %arg1, %c0_i32_7 : i32
    %9 = arith.extui %8 : i1 to i32
    %c0_i32_8 = arith.constant 0 : i32
    %10 = arith.cmpi ne, %9, %c0_i32_8 : i32
    scf.if %10 {
      %c0_9 = arith.constant 0 : index
      %c0_10 = arith.constant 0 : index
      %11 = vector.load %arg8[%c0_9, %c0_10] : memref<2x32xf32, #tpu.memory_space<vmem>>, vector<2x32xf32>
      %cst_11 = arith.constant 1.250000e-01 : f32
      %12 = vector.broadcast %cst_11 : f32 to vector<2x32xf32>
      %13 = arith.mulf %11, %12 : vector<2x32xf32>
      %c0_12 = arith.constant 0 : index
      %c0_13 = arith.constant 0 : index
      %14 = vector.load %arg3[%c0_12, %c0_13] : memref<32x32xf32, #tpu.memory_space<vmem>>, vector<32x32xf32>
      %cst_14 = arith.constant dense<0.000000e+00> : vector<2x32xf32>
      %15 = tpu.matmul %13, %14, %cst_14 {dimension_numbers = #tpu.dot_dimension_numbers<[1], [0], [0], [1], [0, 0, 1, 1], [], []>} : vector<2x32xf32>, vector<32x32xf32>, vector<2x32xf32> -> vector<2x32xf32>
      %c0_15 = arith.constant 0 : index
      %c0_16 = arith.constant 0 : index
      %16 = vector.load %arg4[%c0_15, %c0_16] : memref<1x32xf32, #tpu.memory_space<vmem>>, vector<1x32xf32>
      %17 = vector.broadcast %16 : vector<1x32xf32> to vector<2x32xf32>
      %18 = arith.addf %15, %17 : vector<2x32xf32>
      %19 = math.tanh %18 : vector<2x32xf32>
      %c0_17 = arith.constant 0 : index
      %c0_18 = arith.constant 0 : index
      %20 = vector.load %arg5[%c0_17, %c0_18] : memref<32x128xf32, #tpu.memory_space<vmem>>, vector<32x128xf32>
      %cst_19 = arith.constant dense<0.000000e+00> : vector<2x128xf32>
      %21 = tpu.matmul %19, %20, %cst_19 {dimension_numbers = #tpu.dot_dimension_numbers<[1], [0], [0], [1], [0, 0, 1, 1], [], []>} : vector<2x32xf32>, vector<32x128xf32>, vector<2x128xf32> -> vector<2x128xf32>
      %c0_20 = arith.constant 0 : index
      %c0_21 = arith.constant 0 : index
      %22 = vector.load %arg6[%c0_20, %c0_21] : memref<1x128xf32, #tpu.memory_space<vmem>>, vector<1x128xf32>
      %23 = vector.broadcast %22 : vector<1x128xf32> to vector<2x128xf32>
      %24 = arith.addf %21, %23 : vector<2x128xf32>
      %c0_22 = arith.constant 0 : index
      %c0_23 = arith.constant 0 : index
      %25 = vector.load %arg7[%c0_22, %c0_23] : memref<2x128xf32, #tpu.memory_space<vmem>>, vector<2x128xf32>
      tpu.vector_store %arg7[%c0_22, %c0_23], %24 {strides = array<i32>} : memref<2x128xf32, #tpu.memory_space<vmem>>, vector<2x128xf32>,
    } else {
    }
    return
  }
  func.func @transform_0(%arg0: i32, %arg1: i32) -> (i32, i32, i32) {
    %c0_i32 = arith.constant 0 : i32
    %c0_i32_0 = arith.constant 0 : i32
    return %arg0, %arg1, %c0_i32 : i32, i32, i32
  }
  func.func @transform_1(%arg0: i32, %arg1: i32) -> (i32, i32) {
    %c0_i32 = arith.constant 0 : i32
    %c0_i32_0 = arith.constant 0 : i32
    %c0_i32_1 = arith.constant 0 : i32
    return %c0_i32, %c0_i32_0 : i32, i32
  }
  func.func @transform_2(%arg0: i32, %arg1: i32) -> (i32, i32) {
    %c0_i32 = arith.constant 0 : i32
    %c0_i32_0 = arith.constant 0 : i32
    %c0_i32_1 = arith.constant 0 : i32
    return %c0_i32, %c0_i32_0 : i32, i32
  }
  func.func @transform_3(%arg0: i32, %arg1: i32) -> (i32, i32) {
    %c0_i32 = arith.constant 0 : i32
    %c0_i32_0 = arith.constant 0 : i32
    %c0_i32_1 = arith.constant 0 : i32
    return %c0_i32, %c0_i32_0 : i32, i32
  }
  func.func @transform_4(%arg0: i32, %arg1: i32) -> (i32, i32) {
    %c0_i32 = arith.constant 0 : i32
    %c0_i32_0 = arith.constant 0 : i32
    %c0_i32_1 = arith.constant 0 : i32
    return %c0_i32, %c0_i32_0 : i32, i32
  }
  func.func @transform_5(%arg0: i32, %arg1: i32) -> (i32, i32) {
    %c0_i32 = arith.constant 0 : i32
    %c0_i32_0 = arith.constant 0 : i32
    return %arg0, %c0_i32 : i32, i32
  }
}

</mosaic_0001>

<bundles_post_ra>
// kernel: tpu_custom_call.1
= control target key start
LH: loop header
LB: loop body
LE: loop exit
PB: predicated region body
PF: predicated region fallthrough
CT: control target
= control target key end

     0   :  { %10 = vsyncpa [#allocation4], 0  ;;  %s553_s0 = inlined_call_operand.hbm [shape: f32[2,8,32], index: 0, kind: input, shape index: {}]   ;;  %s554_s1 = inlined_call_operand.hbm [shape: f32[32,32], index: 1, kind: input, shape index: {}]   ;;  %s555_s2 = inlined_call_operand.vmem [shape: f32[1,32], index: 2, kind: input, shape index: {}]   ;;  %s556_s3 = inlined_call_operand.hbm [shape: f32[32,128], index: 3, kind: input, shape index: {}]   ;;  %s557_s4 = inlined_call_operand.vmem [shape: f32[1,128], index: 4, kind: input, shape index: {}]   ;;  %s558_s5 = inlined_call_operand.hbm [shape: f32[2,128], index: 5, kind: output, shape index: {}]  }
   0x1   :  { %11 = vsyncpa [#allocation7], 0 }
   0x2   :  { %12 = vsyncpa [#allocation5], 0  ;;  %s438_s18 = smov [#allocation6]   ;;  %s439_s20 = smov [#allocation3]  }
   0x3   :  { %s30_s19 = sshll.u32 %s438_s18, 4  ;;  %s18_s21 = sshll.u32 %s439_s20, 4  ;;  %s31_s19 = int_to_ptr.vmem [resolvable:$true] %s30_s19  ;;  %s477_s21 = int_to_ptr.vmem [resolvable:$true] %s18_s21 }
   0x4   :  { %s344_s24 = scalar_lea.hbm %s554_s1, 512 }
   0x5   :  { %p345_p0 = scmp.ne.s32.totalorder %s554_s1, %s344_s24  ;;  %p348_p1 = scmp.lt.u32.totalorder %s344_s24, %s554_s1 }
   0x7   :  { %p350_p2 = pnand %p348_p1, %p345_p0 }
   0x9   :  { %353 = shalt.err (!%p350_p2)
}
   0xa   :  { %s354_s29 = scalar_lea.vmem %s31_s19, 512  ;;  %p359_p4 = scmp.lt.s32.totalorder %s31_s19, %s31_s19 }
   0xb   :  { %p355_p3 = scmp.ne.s32.totalorder %s31_s19, %s354_s29  ;;  %p360_p5 = scmp.lt.s32.totalorder %s354_s29, %s354_s29 }
   0xd   :  { %p361_p6 = por %p360_p5, %p359_p4 }
   0xf   :  { %p362_p7 = pnand %p361_p6, %p355_p3 }
  0x11   :  { %365 = shalt.err (!%p362_p7)
}
  0x12   :  { %s440_s30 = smov 128   ;;  %s441_s6 = smov 8  }
  0x13   :  { %36 = dma.hbm_to_vmem [thread:$0]  %s554_s1, 512, %s31_s19, [#allocation7], %s440_s30, %s440_s30, %s441_s6  }
  0x14   :  { %s366_s11 = scalar_lea.hbm %s553_s0, 256 }
  0x15   :  { %p367_p8 = scmp.ne.s32.totalorder %s553_s0, %s366_s11  ;;  %p370_p9 = scmp.lt.u32.totalorder %s366_s11, %s553_s0 }
  0x17   :  { %p372_p10 = pnand %p370_p9, %p367_p8 }
  0x19   :  { %375 = shalt.err (!%p372_p10)
}
  0x1a   :  { %s376_s16 = scalar_lea.vmem %s477_s21, 256  ;;  %p381_p12 = scmp.lt.s32.totalorder %s477_s21, %s477_s21 }
  0x1b   :  { %p377_p11 = scmp.ne.s32.totalorder %s477_s21, %s376_s16  ;;  %p382_p13 = scmp.lt.s32.totalorder %s376_s16, %s376_s16 }
  0x1d   :  { %p383_p0 = por %p382_p13, %p381_p12 }
  0x1f   :  { %p384_p1 = pnand %p383_p0, %p377_p11 }
  0x21   :  { %387 = shalt.err (!%p384_p1)
}
  0x22   :  { %24 = dma.hbm_to_vmem [thread:$0]  %s553_s0, 256, %s477_s21, [#allocation4], %s440_s30, %s440_s30, %s441_s6  }
  0x23   :  { %s442_s18 = smov [#allocation8]   ;;  %s388_s23 = scalar_lea.hbm %s556_s3, 512 }
  0x24   :  { %s44_s19 = sshll.u32 %s442_s18, 4  ;;  %p389_p2 = scmp.ne.s32.totalorder %s556_s3, %s388_s23  ;;  %s45_s19 = int_to_ptr.vmem [resolvable:$true] %s44_s19 }
  0x25   :  { %p392_p3 = scmp.lt.u32.totalorder %s388_s23, %s556_s3 }
  0x27   :  { %p394_p4 = pnand %p392_p3, %p389_p2 }
  0x29   :  { %397 = shalt.err (!%p394_p4)
}
  0x2a   :  { %s398_s28 = scalar_lea.vmem %s45_s19, 512  ;;  %p403_p6 = scmp.lt.s32.totalorder %s45_s19, %s45_s19 }
  0x2b   :  { %p399_p5 = scmp.ne.s32.totalorder %s45_s19, %s398_s28  ;;  %p404_p7 = scmp.lt.s32.totalorder %s398_s28, %s398_s28 }
  0x2d   :  { %p405_p8 = por %p404_p7, %p403_p6 }
  0x2f   :  { %p406_p9 = pnand %p405_p8, %p399_p5 }
  0x31   :  { %409 = shalt.err (!%p406_p9)
}
  0x32   :  { %50 = dma.hbm_to_vmem [thread:$0]  %s556_s3, 512, %s45_s19, [#allocation7], %s440_s30, %s440_s30, %s441_s6  }
  0x33   :  { %432 = dma.done.wait [#allocation4], 256  }
  0x34   :  { %433 = vsyncadd [#allocation4], 4294967040 }
  0x35   :  { %434 = dma.done.wait [#allocation7], 1024  }
  0x36   :  { %435 = vsyncadd [#allocation7], 4294966272  ;;  %vm66_vm0 = vcmask 254976   ;;  %v443_v0 = vmov 0.0|0.0   ;;  %v444_v1 = vmov 0.0   ;;  %vm445_vm1 = vmmov 0  }
  0x37   :  { %321 = vmatprep.subr.bf16.mxu0 %v443_v0  ;;  %67 = vst.msk [vmem:[#allocation2] sm:$0x3] %vm66_vm0, %v444_v1  ;;  %307 = vmatprep.mubr.msk.f32.mxu0 %vm445_vm1, %v444_v1  ;;  %vm71_vm2 = vcmask 261120   ;;  %v99_v2 = vld [vmem:[#allocation6] sm:$0xff]  ;;  %v100_v3 = vld [vmem:[#allocation6 + $0x8] sm:$0xff]  ;;  %v101_v4 = vld [vmem:[#allocation6 + $0x10] sm:$0xff] }
  0x38   :  { %327 = vmatprep.subr.bf16.mxu1 %v443_v0  ;;  %318 = vmatprep.mubr.msk.f32.mxu1 %vm445_vm1, %v444_v1  ;;  %v322_v5 = vpack.c.bf16 %v100_v3, %v99_v2  ;;  %v102_v6 = vld [vmem:[#allocation6 + $0x18] sm:$0xff]  ;;  %v68_v7 = vld [vmem:[#allocation3] sm:$0xff]  ;;  %vm88_vm3 = vcmask 1041409   ;;  %v184_v29 = vld [vmem:[#allocation8] sm:$0xff]  ;;  %s446_s7 = smov [#allocation9]  }
  0x39   :  { %v69_v8 = vld [vmem:[#allocation3 + $0x8] sm:$0xff]  ;;  %v72_v9 = vsel %vm71_vm2, %v68_v7, 0.0  ;;  %v325_v11 = vpack.c.bf16 %v102_v6, %v101_v4  ;;  %v185_v30 = vld [vmem:[#allocation8 + $0x8] sm:$0xff]  ;;  %v186_v31 = vld [vmem:[#allocation8 + $0x10] sm:$0xff]  ;;  %s275_s8 = sshll.u32 %s446_s7, 4  ;;  %s276_s8 = int_to_ptr.vmem [resolvable:$true] %s275_s8 }
  0x3a   :  { %v79_v10 = vsel %vm71_vm2, %v69_v8, 0.0  ;;  %323 = vmatpush3.bf16.msra.mxu0 %v322_v5  ;;  %v73_v12 = vrot.slane %v72_v9, 4  ;;  %v328_v32 = vpack.c.bf16 %v185_v30, %v184_v29  ;;  %v187_v33 = vld [vmem:[#allocation8 + $0x18] sm:$0xff]  ;;  %v285_v35 = vld [vmem:[%s555_s2] ss:$0 sm:$0xff]  ;;  %s410_s9 = scalar_lea.vmem %s276_s8, 32  ;;  %p415_p11 = scmp.lt.s32.totalorder %s276_s8, %s276_s8 }
  0x3b   :  { %v80_v13 = vrot.slane %v79_v10, 4  ;;  %324 = vmatprep.subr.bf16.mxu0 %v443_v0  ;;  %v331_v34 = vpack.c.bf16 %v187_v33, %v186_v31  ;;  %v287_v40 = vld [vmem:[%s557_s4] ss:$0 sm:$0xff]  ;;  %p411_p10 = scmp.ne.s32.totalorder %s276_s8, %s410_s9  ;;  %p416_p12 = scmp.lt.s32.totalorder %s410_s9, %s410_s9 }
  0x3c   :  { %v74_v14 = vadd.f32 %v73_v12, %v72_v9  ;;  %329 = vmatpush3.bf16.msra.mxu1 %v328_v32 }
  0x3d   :  { %v81_v15 = vadd.f32 %v80_v13, %v79_v10  ;;  %330 = vmatprep.subr.bf16.mxu1 %v443_v0  ;;  %p417_p13 = por %p416_p12, %p415_p11 }
  0x3e   :  { %326 = vmatpush3.bf16.msra.mxu0 %v325_v11  ;;  %v75_v16 = vrot.slane %v74_v14, 2  ;;  %v70_v22 = vld [vmem:[#allocation2] sm:$0x3] }
  0x3f   :  { %v82_v17 = vrot.slane %v81_v15, 2  ;;  %p418_p0 = pnand %p417_p13, %p411_p10 }
  0x40   :  { %v76_v18 = vadd.f32 %v75_v16, %v74_v14  ;;  %332 = vmatpush3.bf16.msra.mxu1 %v331_v34 }
  0x41   :  { %v83_v19 = vadd.f32 %v82_v17, %v81_v15 }
  0x42   :  { %v77_v20 = vrot.slane %v76_v18, 1 }
  0x43   :  { %v84_v21 = vrot.slane %v83_v19, 1 }
  0x44   :  { %v78_v23 = vadd.f32 %v77_v20, %v76_v18 }
  0x45   :  { %v85_v24 = vadd.f32 %v84_v21, %v83_v19 }
  0x47   :  { %v89_v25 = vsel %vm88_vm3, %v85_v24, %v78_v23 }
  0x48   :  { %v91_v26 = vadd.f32 %v89_v25, %v70_v22 }
  0x4a   :  { %93 = vst.msk [vmem:[#allocation2] sm:$0x3] %vm66_vm0, %v91_v26 }
  0x51   :  { %v97_v27 = vld [vmem:[#allocation2] sm:$0x3] }
  0x52   :  { %v98_v28 = vmul.f32 0.125, %v97_v27 }
  0x54   :  { %308 = vmatmul.mubr.msk.f32.vlgmr.msra.gmra.mrb[0].mxu0 %vm71_vm2, %v98_v28 }
 0x127   :  { %v179_v36 = vpop.f32.mrb[0].mxu0 }
 0x128   :  { %v180_v37 = vadd.f32 %v285_v35, %v179_v36  ;;  %v309_v38 = vpop.f32.mrb[1].mxu0 }
 0x12a   :  { %342 = vtanh.f32 %v180_v37 }
 0x134   :  { %v343_v39 = vpop.eup %342 }
 0x135   :  { %319 = vmatmul.mubr.msk.f32.vlgmr.msra.gmra.mrb[0].mxu1 %vm71_vm2, %v343_v39 }
 0x208   :  { %v264_v41 = vpop.f32.mrb[0].mxu1 }
 0x209   :  { %v265_v42 = vadd.f32 %v287_v40, %v264_v41  ;;  %v320_v43 = vpop.f32.mrb[1].mxu1 }
 0x20b   :  { %268 = vst [vmem:[#allocation9] sm:$0x3] %v265_v42 }
 0x20c   :  { %421 = shalt.err (!%p418_p0)
}
 0x20d   :  { %s422_s11 = scalar_lea.hbm %s558_s5, 32 }
 0x20e   :  { %p423_p1 = scmp.ne.s32.totalorder %s558_s5, %s422_s11  ;;  %p426_p2 = scmp.lt.u32.totalorder %s422_s11, %s558_s5 }
 0x210   :  { %p428_p3 = pnand %p426_p2, %p423_p1 }
 0x212   :  { %431 = shalt.err (!%p428_p3)
}
 0x213   :  { %278 = dma.vmem_to_hbm [thread:$0]  %s276_s8, 32, %s558_s5, [#allocation5]  }
 0x214   :  { %436 = dma.done.wait [#allocation5], 32  }
 0x215   :  { %437 = vsyncadd [#allocation5], 4294967264 }
 0x216   :  { %282 = vsyncpa [#allocation4], 1 }
 0x217   :  { %283 = vsyncpa [#allocation7], 1 }
 0x218   :  { %284 = vsyncpa [#allocation5], 1 }

// kernel: tpu_custom_call.1
= control target key start
LH: loop header
LB: loop body
LE: loop exit
PB: predicated region body
PF: predicated region fallthrough
CT: control target
= control target key end

     0   :  { %10 = vsyncpa [#allocation4], 0  ;;  %s553_s0 = inlined_call_operand.hbm [shape: f32[2,8,32], index: 0, kind: input, shape index: {}]   ;;  %s554_s1 = inlined_call_operand.hbm [shape: f32[32,32], index: 1, kind: input, shape index: {}]   ;;  %s555_s2 = inlined_call_operand.vmem [shape: f32[1,32], index: 2, kind: input, shape index: {}]   ;;  %s556_s3 = inlined_call_operand.hbm [shape: f32[32,128], index: 3, kind: input, shape index: {}]   ;;  %s557_s4 = inlined_call_operand.vmem [shape: f32[1,128], index: 4, kind: input, shape index: {}]   ;;  %s558_s5 = inlined_call_operand.hbm [shape: f32[2,128], index: 5, kind: output, shape index: {}]  }
   0x1   :  { %11 = vsyncpa [#allocation7], 0 }
   0x2   :  { %12 = vsyncpa [#allocation5], 0  ;;  %s438_s18 = smov [#allocation6]   ;;  %s439_s20 = smov [#allocation3]  }
   0x3   :  { %s30_s19 = sshll.u32 %s438_s18, 4  ;;  %s18_s21 = sshll.u32 %s439_s20, 4  ;;  %s31_s19 = int_to_ptr.vmem [resolvable:$true] %s30_s19  ;;  %s477_s21 = int_to_ptr.vmem [resolvable:$true] %s18_s21 }
   0x4   :  { %s344_s24 = scalar_lea.hbm %s554_s1, 512 }
   0x5   :  { %p345_p0 = scmp.ne.s32.totalorder %s554_s1, %s344_s24  ;;  %p348_p1 = scmp.lt.u32.totalorder %s344_s24, %s554_s1 }
   0x7   :  { %p350_p2 = pnand %p348_p1, %p345_p0 }
   0x9   :  { %353 = shalt.err (!%p350_p2)
}
   0xa   :  { %s354_s29 = scalar_lea.vmem %s31_s19, 512  ;;  %p359_p4 = scmp.lt.s32.totalorder %s31_s19, %s31_s19 }
   0xb   :  { %p355_p3 = scmp.ne.s32.totalorder %s31_s19, %s354_s29  ;;  %p360_p5 = scmp.lt.s32.totalorder %s354_s29, %s354_s29 }
   0xd   :  { %p361_p6 = por %p360_p5, %p359_p4 }
   0xf   :  { %p362_p7 = pnand %p361_p6, %p355_p3 }
  0x11   :  { %365 = shalt.err (!%p362_p7)
}
  0x12   :  { %s440_s30 = smov 128   ;;  %s441_s6 = smov 8  }
  0x13   :  { %36 = dma.hbm_to_vmem [thread:$0]  %s554_s1, 512, %s31_s19, [#allocation7], %s440_s30, %s440_s30, %s441_s6  }
  0x14   :  { %s366_s11 = scalar_lea.hbm %s553_s0, 256 }
  0x15   :  { %p367_p8 = scmp.ne.s32.totalorder %s553_s0, %s366_s11  ;;  %p370_p9 = scmp.lt.u32.totalorder %s366_s11, %s553_s0 }
  0x17   :  { %p372_p10 = pnand %p370_p9, %p367_p8 }
  0x19   :  { %375 = shalt.err (!%p372_p10)
}
  0x1a   :  { %s376_s16 = scalar_lea.vmem %s477_s21, 256  ;;  %p381_p12 = scmp.lt.s32.totalorder %s477_s21, %s477_s21 }
  0x1b   :  { %p377_p11 = scmp.ne.s32.totalorder %s477_s21, %s376_s16  ;;  %p382_p13 = scmp.lt.s32.totalorder %s376_s16, %s376_s16 }
  0x1d   :  { %p383_p0 = por %p382_p13, %p381_p12 }
  0x1f   :  { %p384_p1 = pnand %p383_p0, %p377_p11 }
  0x21   :  { %387 = shalt.err (!%p384_p1)
}
  0x22   :  { %24 = dma.hbm_to_vmem [thread:$0]  %s553_s0, 256, %s477_s21, [#allocation4], %s440_s30, %s440_s30, %s441_s6  }
  0x23   :  { %s442_s18 = smov [#allocation8]   ;;  %s388_s23 = scalar_lea.hbm %s556_s3, 512 }
  0x24   :  { %s44_s19 = sshll.u32 %s442_s18, 4  ;;  %p389_p2 = scmp.ne.s32.totalorder %s556_s3, %s388_s23  ;;  %s45_s19 = int_to_ptr.vmem [resolvable:$true] %s44_s19 }
  0x25   :  { %p392_p3 = scmp.lt.u32.totalorder %s388_s23, %s556_s3 }
  0x27   :  { %p394_p4 = pnand %p392_p3, %p389_p2 }
  0x29   :  { %397 = shalt.err (!%p394_p4)
}
  0x2a   :  { %s398_s28 = scalar_lea.vmem %s45_s19, 512  ;;  %p403_p6 = scmp.lt.s32.totalorder %s45_s19, %s45_s19 }
  0x2b   :  { %p399_p5 = scmp.ne.s32.totalorder %s45_s19, %s398_s28  ;;  %p404_p7 = scmp.lt.s32.totalorder %s398_s28, %s398_s28 }
  0x2d   :  { %p405_p8 = por %p404_p7, %p403_p6 }
  0x2f   :  { %p406_p9 = pnand %p405_p8, %p399_p5 }
  0x31   :  { %409 = shalt.err (!%p406_p9)
}
  0x32   :  { %50 = dma.hbm_to_vmem [thread:$0]  %s556_s3, 512, %s45_s19, [#allocation7], %s440_s30, %s440_s30, %s441_s6  }
  0x33   :  { %432 = dma.done.wait [#allocation4], 256  }
  0x34   :  { %433 = vsyncadd [#allocation4], 4294967040 }
  0x35   :  { %434 = dma.done.wait [#allocation7], 1024  }
  0x36   :  { %435 = vsyncadd [#allocation7], 4294966272  ;;  %vm66_vm0 = vcmask 254976   ;;  %v443_v0 = vmov 0.0|0.0   ;;  %v444_v1 = vmov 0.0   ;;  %vm445_vm1 = vmmov 0  }
  0x37   :  { %321 = vmatprep.subr.bf16.mxu0 %v443_v0  ;;  %67 = vst.msk [vmem:[#allocation2] sm:$0x3] %vm66_vm0, %v444_v1  ;;  %307 = vmatprep.mubr.msk.f32.mxu0 %vm445_vm1, %v444_v1  ;;  %vm71_vm2 = vcmask 261120   ;;  %v99_v2 = vld [vmem:[#allocation6] sm:$0xff]  ;;  %v100_v3 = vld [vmem:[#allocation6 + $0x8] sm:$0xff]  ;;  %v101_v4 = vld [vmem:[#allocation6 + $0x10] sm:$0xff] }
  0x38   :  { %327 = vmatprep.subr.bf16.mxu1 %v443_v0  ;;  %318 = vmatprep.mubr.msk.f32.mxu1 %vm445_vm1, %v444_v1  ;;  %v322_v5 = vpack.c.bf16 %v100_v3, %v99_v2  ;;  %v102_v6 = vld [vmem:[#allocation6 + $0x18] sm:$0xff]  ;;  %v68_v7 = vld [vmem:[#allocation3] sm:$0xff]  ;;  %vm88_vm3 = vcmask 1041409   ;;  %v184_v29 = vld [vmem:[#allocation8] sm:$0xff]  ;;  %s446_s7 = smov [#allocation9]  }
  0x39   :  { %v69_v8 = vld [vmem:[#allocation3 + $0x8] sm:$0xff]  ;;  %v72_v9 = vsel %vm71_vm2, %v68_v7, 0.0  ;;  %v325_v11 = vpack.c.bf16 %v102_v6, %v101_v4  ;;  %v185_v30 = vld [vmem:[#allocation8 + $0x8] sm:$0xff]  ;;  %v186_v31 = vld [vmem:[#allocation8 + $0x10] sm:$0xff]  ;;  %s275_s8 = sshll.u32 %s446_s7, 4  ;;  %s276_s8 = int_to_ptr.vmem [resolvable:$true] %s275_s8 }
  0x3a   :  { %v79_v10 = vsel %vm71_vm2, %v69_v8, 0.0  ;;  %323 = vmatpush3.bf16.msra.mxu0 %v322_v5  ;;  %v73_v12 = vrot.slane %v72_v9, 4  ;;  %v328_v32 = vpack.c.bf16 %v185_v30, %v184_v29  ;;  %v187_v33 = vld [vmem:[#allocation8 + $0x18] sm:$0xff]  ;;  %v285_v35 = vld [vmem:[%s555_s2] ss:$0 sm:$0xff]  ;;  %s410_s9 = scalar_lea.vmem %s276_s8, 32  ;;  %p415_p11 = scmp.lt.s32.totalorder %s276_s8, %s276_s8 }
  0x3b   :  { %v80_v13 = vrot.slane %v79_v10, 4  ;;  %324 = vmatprep.subr.bf16.mxu0 %v443_v0  ;;  %v331_v34 = vpack.c.bf16 %v187_v33, %v186_v31  ;;  %v287_v40 = vld [vmem:[%s557_s4] ss:$0 sm:$0xff]  ;;  %p411_p10 = scmp.ne.s32.totalorder %s276_s8, %s410_s9  ;;  %p416_p12 = scmp.lt.s32.totalorder %s410_s9, %s410_s9 }
  0x3c   :  { %v74_v14 = vadd.f32 %v73_v12, %v72_v9  ;;  %329 = vmatpush3.bf16.msra.mxu1 %v328_v32 }
  0x3d   :  { %v81_v15 = vadd.f32 %v80_v13, %v79_v10  ;;  %330 = vmatprep.subr.bf16.mxu1 %v443_v0  ;;  %p417_p13 = por %p416_p12, %p415_p11 }
  0x3e   :  { %326 = vmatpush3.bf16.msra.mxu0 %v325_v11  ;;  %v75_v16 = vrot.slane %v74_v14, 2  ;;  %v70_v22 = vld [vmem:[#allocation2] sm:$0x3] }
  0x3f   :  { %v82_v17 = vrot.slane %v81_v15, 2  ;;  %p418_p0 = pnand %p417_p13, %p411_p10 }
  0x40   :  { %v76_v18 = vadd.f32 %v75_v16, %v74_v14  ;;  %332 = vmatpush3.bf16.msra.mxu1 %v331_v34 }
  0x41   :  { %v83_v19 = vadd.f32 %v82_v17, %v81_v15 }
  0x42   :  { %v77_v20 = vrot.slane %v76_v18, 1 }
  0x43   :  { %v84_v21 = vrot.slane %v83_v19, 1 }
  0x44   :  { %v78_v23 = vadd.f32 %v77_v20, %v76_v18 }
  0x45   :  { %v85_v24 = vadd.f32 %v84_v21, %v83_v19 }
  0x47   :  { %v89_v25 = vsel %vm88_vm3, %v85_v24, %v78_v23 }
  0x48   :  { %v91_v26 = vadd.f32 %v89_v25, %v70_v22 }
  0x4a   :  { %93 = vst.msk [vmem:[#allocation2] sm:$0x3] %vm66_vm0, %v91_v26 }
  0x51   :  { %v97_v27 = vld [vmem:[#allocation2] sm:$0x3] }
  0x52   :  { %v98_v28 = vmul.f32 0.125, %v97_v27 }
  0x54   :  { %308 = vmatmul.mubr.msk.f32.vlgmr.msra.gmra.mrb[0].mxu0 %vm71_vm2, %v98_v28 }
 0x127   :  { %v179_v36 = vpop.f32.mrb[0].mxu0 }
 0x128   :  { %v180_v37 = vadd.f32 %v285_v35, %v179_v36  ;;  %v309_v38 = vpop.f32.mrb[1].mxu0 }
 0x12a   :  { %342 = vtanh.f32 %v180_v37 }
 0x134   :  { %v343_v39 = vpop.eup %342 }
 0x135   :  { %319 = vmatmul.mubr.msk.f32.vlgmr.msra.gmra.mrb[0].mxu1 %vm71_vm2, %v343_v39 }
 0x208   :  { %v264_v41 = vpop.f32.mrb[0].mxu1 }
 0x209   :  { %v265_v42 = vadd.f32 %v287_v40, %v264_v41  ;;  %v320_v43 = vpop.f32.mrb[1].mxu1 }
 0x20b   :  { %268 = vst [vmem:[#allocation9] sm:$0x3] %v265_v42 }
 0x20c   :  { %421 = shalt.err (!%p418_p0)
}
 0x20d   :  { %s422_s11 = scalar_lea.hbm %s558_s5, 32 }
 0x20e   :  { %p423_p1 = scmp.ne.s32.totalorder %s558_s5, %s422_s11  ;;  %p426_p2 = scmp.lt.u32.totalorder %s422_s11, %s558_s5 }
 0x210   :  { %p428_p3 = pnand %p426_p2, %p423_p1 }
 0x212   :  { %431 = shalt.err (!%p428_p3)
}
 0x213   :  { %278 = dma.vmem_to_hbm [thread:$0]  %s276_s8, 32, %s558_s5, [#allocation5]  }
 0x214   :  { %436 = dma.done.wait [#allocation5], 32  }
 0x215   :  { %437 = vsyncadd [#allocation5], 4294967264 }
 0x216   :  { %282 = vsyncpa [#allocation4], 1 }
 0x217   :  { %283 = vsyncpa [#allocation7], 1 }
 0x218   :  { %284 = vsyncpa [#allocation5], 1 }

</bundles_post_ra>
